<compile_context>
chip_gen: v7x
topology: tpu7x:2x2x1
jax: 0.10.0
libtpu: 0.0.40
codegen_flags: <defaults>
</compile_context>

<pallas_src>
import functools

import jax
import jax.numpy as jnp
from jax import lax
from jax.experimental import pallas as pl
from jax.experimental.pallas import tpu as pltpu


def _round_up(x, m):
    return (x + m - 1) // m * m


def _vmem_capacity_bytes():
    try:
        return int(pltpu.get_tpu_info().vmem_capacity_bytes)
    except Exception:
        return 64 * 1024 * 1024          # be conservative (v7x per-TC VMEM)


# ------------------------- Pallas kernels -------------------------

def _conv_tile(xf_ref, w_ref, j, *, tile_m, row_stride, n_kh):
    """One tile of 3x3 conv outputs with taps packed into the MXU K dim.

    xf_ref: (rows_in*Wr, KT) bf16 -- whole image, spatial dims flattened,
            KT = 3*Cin (kw packed) or 9*Cin (all taps packed, n_kh == 1).
    w_ref : (n_kh, KT, Cp) bf16 -- matching tap-packed weights.
    Returns (tile_m, Cp) f32 accumulated on the MXU (n_kh dots, K = KT).
    """
    cp = w_ref.shape[-1]
    base = pl.multiple_of(j * tile_m, 8)        # tile_m is a multiple of 8
    acc = jnp.zeros((tile_m, cp), jnp.float32)
    for kh in range(n_kh):
        # row_stride % 8 == 0  ->  every slice start is sublane-aligned.
        a = xf_ref[pl.ds(base + kh * row_stride, tile_m), :]    # (tile_m, KT)
        acc = acc + jnp.dot(a, w_ref[kh], preferred_element_type=jnp.float32)
    return acc


def conv_stats_kernel(xf_ref, w_ref, sum_ref, sq_ref, *,
                      tile_m, row_stride, n_kh, w_valid, wr):
    """Per-image partial channel sum / sum-of-squares of the conv output."""
    j = pl.program_id(1)

    @pl.when(j == 0)
    def _init():
        sum_ref[...] = jnp.zeros_like(sum_ref)
        sq_ref[...] = jnp.zeros_like(sq_ref)

    acc = _conv_tile(xf_ref, w_ref, j, tile_m=tile_m,
                     row_stride=row_stride, n_kh=n_kh)
    if wr != w_valid:
        # Mask the right-pad columns out of the batch statistics; generated
        # in-kernel from iota (no extra input DMA stream / descriptor).
        col = lax.broadcasted_iota(jnp.int32, (tile_m, 1), 0) % wr
        accm = jnp.where(col < w_valid, acc, 0.0)
    else:
        accm = acc
    # VPU/XLU reduction keeps the (bottleneck) MXU free.
    sum_ref[...] += jnp.sum(accm, axis=0, keepdims=True)
    sq_ref[...] += jnp.sum(accm * acc, axis=0, keepdims=True)


def conv_bn_relu_kernel(xf_ref, w_ref, scale_ref, shift_ref, out_ref, *,
                        tile_m, row_stride, n_kh, th, w_valid, wr, cout_p):
    """Recompute the conv tile, fold BN affine + ReLU, store NCHW-friendly."""
    j = pl.program_id(1)
    acc = _conv_tile(xf_ref, w_ref, j, tile_m=tile_m,
                     row_stride=row_stride, n_kh=n_kh)
    y = jnp.maximum(acc * scale_ref[...] + shift_ref[...], 0.0)   # (tile_m, Cp)
    cp = y.shape[-1]
    if wr != w_valid:
        # Drop the right-pad columns so only valid pixels are stored.
        y = y.reshape(th, wr, cp)[:, :w_valid, :].reshape(th * w_valid, cp)
    # Transpose on the XLU (slack in this MXU-bound kernel) so the store is
    # channel-major and only Cout (padded to 8 sublanes) channels hit HBM;
    # the lane dim of the store is TH*W (multiple of 128 by construction).
    out_ref[...] = y.T[:cout_p, :]


# ------------------------- Wrapper -------------------------

@functools.partial(jax.jit, static_argnames=("eps",))
def conv_bn_relu(x_nchw, weight, gamma, beta, eps=1e-5):
    """x_nchw: (N, Cin, H, W) f32; weight: (Cout, Cin, 3, 3) f32.
    Returns (N, Cout, H, W) f32, matching PyTorch ConvBNReLU.forward in
    training mode (BN uses biased batch statistics).  Precision contract:
    conv operands are rounded to bf16 (f32 MXU accumulation)."""
    N, Cin, H, W = x_nchw.shape
    Cout = weight.shape[0]
    Cp = _round_up(Cout, 128)            # MXU / lane-dense output channels
    cout_p = _round_up(Cout, 8)          # sublane-aligned channels stored
    Wr = _round_up(W, 8)                 # aligned flattened row stride

    # Tap packing into the MXU K dim: kw always; kh too for stem-like Cin.
    if Cin <= 16:
        n_kh = 1                         # K = 9*Cin, no halo rows needed
        KT = 9 * Cin
        rows_in = H
    else:
        n_kh = 3                         # K = 3*Cin, kh via row-shifted slices
        KT = 3 * Cin
        rows_in = H + 2

    # Generation-aware sizing.
    vmem_cap = _vmem_capacity_bytes()
    block_rows = 1024 if vmem_cap > 96 * 1024 * 1024 else 512
    th_target = max(1, block_rows // Wr)
    divs = [d for d in range(1, H + 1) if H % d == 0]
    good = [d for d in divs if d <= th_target and (d * W) % 128 == 0]
    if good:
        TH = max(good)                   # lane-dense (TH*W % 128 == 0) tiles
    else:
        # Full-image tile: out block spans the whole H*W axis (always legal).
        TH = H
    nj = H // TH
    tile_m = TH * Wr                     # flat rows per tile (multiple of 8)
    in_len = rows_in * Wr
    vmem_limit = min(int(0.75 * vmem_cap), 96 * 1024 * 1024)

    # --- glue: NCHW -> NHWC, pad, tap-pack into channels, flatten, bf16 ---
    x_nhwc = jnp.transpose(x_nchw, (0, 2, 3, 1)).astype(jnp.float32)
    xpad = jnp.pad(x_nhwc, ((0, 0), (1, 1), (1, 1), (0, 0)))   # (N, H+2, W+2, Cin)
    if n_kh == 1:
        parts = [xpad[:, kh:kh + H, kw:kw + W, :]
                 for kh in range(3) for kw in range(3)]
    else:
        parts = [xpad[:, :, kw:kw + W, :] for kw in range(3)]
    xf = jnp.concatenate(parts, axis=-1)                        # (N, rows_in, W, KT)
    if Wr != W:
        xf = jnp.pad(xf, ((0, 0), (0, 0), (0, Wr - W), (0, 0)))
    xf = xf.reshape(N, in_len, KT).astype(jnp.bfloat16)

    # weights (Cout, Cin, 3, 3) -> (n_kh, KT, Cp) bf16, tap order matching xf.
    w_t = jnp.transpose(weight, (2, 3, 1, 0)).astype(jnp.float32)  # (3,3,Cin,Cout)
    wk = w_t.reshape(n_kh, KT, Cout)
    wk = jnp.pad(wk, ((0, 0), (0, 0), (0, Cp - Cout))).astype(jnp.bfloat16)

    # --- kernel 1: per-image partial channel sum / sum-of-squares ---
    kern1 = functools.partial(conv_stats_kernel, tile_m=tile_m, row_stride=Wr,
                              n_kh=n_kh, w_valid=W, wr=Wr)
    ch_sum, ch_sq = pl.pallas_call(
        kern1,
        out_shape=(
            jax.ShapeDtypeStruct((N, 1, Cp), jnp.float32),
            jax.ShapeDtypeStruct((N, 1, Cp), jnp.float32),
        ),
        grid_spec=pltpu.PrefetchScalarGridSpec(
            num_scalar_prefetch=0,
            grid=(N, nj),
            in_specs=[
                pl.BlockSpec((None, in_len, KT), lambda n, j: (n, 0, 0)),
                pl.BlockSpec((n_kh, KT, Cp), lambda n, j: (0, 0, 0)),
            ],
            out_specs=[
                pl.BlockSpec((None, 1, Cp), lambda n, j: (n, 0, 0)),
                pl.BlockSpec((None, 1, Cp), lambda n, j: (n, 0, 0)),
            ],
        ),
        compiler_params=pltpu.CompilerParams(
            dimension_semantics=("parallel", "arbitrary"),
            vmem_limit_bytes=vmem_limit),
    )(xf, wk)

    # --- glue: fold batch stats into per-channel scale/shift (O(Cp)) ---
    cnt = N * H * W
    mean = jnp.sum(ch_sum, axis=(0, 1)) / cnt                    # (Cp,)
    var = jnp.maximum(jnp.sum(ch_sq, axis=(0, 1)) / cnt - mean * mean, 0.0)
    inv_std = lax.rsqrt(var + eps)
    gamma_p = jnp.pad(gamma.astype(jnp.float32), (0, Cp - Cout),
                      constant_values=1.0)
    beta_p = jnp.pad(beta.astype(jnp.float32), (0, Cp - Cout))
    scale = (gamma_p * inv_std).reshape(1, Cp)
    shift = (beta_p - mean * gamma_p * inv_std).reshape(1, Cp)

    # --- kernel 2: recompute conv + fused BN affine + ReLU, NCHW store ---
    kern2 = functools.partial(conv_bn_relu_kernel, tile_m=tile_m, row_stride=Wr,
                              n_kh=n_kh, th=TH, w_valid=W, wr=Wr, cout_p=cout_p)
    y = pl.pallas_call(
        kern2,
        out_shape=jax.ShapeDtypeStruct((N, cout_p, H * W), jnp.float32),
        grid_spec=pltpu.PrefetchScalarGridSpec(
            num_scalar_prefetch=0,
            grid=(N, nj),
            in_specs=[
                pl.BlockSpec((None, in_len, KT), lambda n, j: (n, 0, 0)),
                pl.BlockSpec((n_kh, KT, Cp), lambda n, j: (0, 0, 0)),
                pl.BlockSpec((1, Cp), lambda n, j: (0, 0)),
                pl.BlockSpec((1, Cp), lambda n, j: (0, 0)),
            ],
            out_specs=pl.BlockSpec((None, cout_p, TH * W),
                                   lambda n, j: (n, 0, j)),
        ),
        compiler_params=pltpu.CompilerParams(
            dimension_semantics=("parallel", "parallel"),
            vmem_limit_bytes=vmem_limit),
    )(xf, wk, scale, shift)

    # Output is already dense NCHW; at most a tiny sublane-pad channel slice.
    return y[:, :Cout, :].reshape(N, Cout, H, W)


# ------------------------- Reference (pure JAX) -------------------------

def conv_bn_relu_ref(x, weight, gamma, beta, eps=1e-5):
    out = lax.conv_general_dilated(
        x, weight, window_strides=(1, 1), padding=((1, 1), (1, 1)),
        dimension_numbers=("NCHW", "OIHW", "NCHW"))
    mean = jnp.mean(out, axis=(0, 2, 3), keepdims=True)
    var = jnp.mean((out - mean) ** 2, axis=(0, 2, 3), keepdims=True)
    out = (out - mean) / jnp.sqrt(var + eps)
    out = out * gamma.reshape(1, -1, 1, 1) + beta.reshape(1, -1, 1, 1)
    return jnp.maximum(out, 0.0)


# ------------------------- Main -------------------------

if __name__ == "__main__":
    key = jax.random.PRNGKey(0)
    k_x, k_w, k_g, k_b = jax.random.split(key, 4)

    N, Cin, H, W = 2, 4, 16, 16
    Cout = 8

    x = jax.random.normal(k_x, (N, Cin, H, W), dtype=jnp.float32)
    # Conv2d weight (Cout, Cin, 3, 3), no bias
    weight = jax.random.normal(k_w, (Cout, Cin, 3, 3), dtype=jnp.float32) * 0.1
    # BatchNorm affine params (non-trivial values to exercise the math)
    gamma = 1.0 + 0.1 * jax.random.normal(k_g, (Cout,), dtype=jnp.float32)
    beta = 0.1 * jax.random.normal(k_b, (Cout,), dtype=jnp.float32)

    out = jax.block_until_ready(conv_bn_relu(x, weight, gamma, beta))

    # The kernel feeds bf16 operands to the MXU (with f32 accumulation), so
    # compare against the f32 reference evaluated on the same bf16-rounded
    # operands (bf16*bf16 products are exact in f32; remaining differences are
    # accumulation-order noise).
    xq = x.astype(jnp.bfloat16).astype(jnp.float32)
    wq = weight.astype(jnp.bfloat16).astype(jnp.float32)
    ref = conv_bn_relu_ref(xq, wq, gamma, beta)

    assert out.shape == (N, Cout, H, W)
    max_err = float(jnp.max(jnp.abs(out - ref)))
    assert jnp.allclose(out, ref, atol=1e-3, rtol=1e-3), max_err

    print("KERNEL_OK")
</pallas_src>

<mosaic_0001>
module attributes {stable_mosaic.version = 11 : i64} {
  func.func @conv_stats_kernel(%arg0: i32, %arg1: i32, %arg2: memref<1x256x36xbf16, #tpu.memory_space<vmem>>, %arg3: memref<1x36x128xbf16, #tpu.memory_space<vmem>>, %arg4: memref<1x1x128xf32, #tpu.memory_space<vmem>>, %arg5: memref<1x1x128xf32, #tpu.memory_space<vmem>>) attributes {dimension_semantics = [#tpu.dimension_semantics<parallel>, #tpu.dimension_semantics<arbitrary>], iteration_bounds = array<i64: 2, 1>, scalar_prefetch = 0 : i64, scratch_operands = 0 : i64, tpu.core_type = #tpu.core_type<tc>, window_params = [{transform_indices = @transform_0, window_bounds = array<i64: 1, 256, 36>}, {pipeline_mode = #tpu.pipeline_mode<synchronous>, transform_indices = @transform_1, window_bounds = array<i64: 1, 36, 128>}, {transform_indices = @transform_2, window_bounds = array<i64: 1, 1, 128>}, {transform_indices = @transform_3, window_bounds = array<i64: 1, 1, 128>}]} {
    %c0_i32 = arith.constant 0 : i32
    %0 = arith.cmpi eq, %arg1, %c0_i32 : i32
    %1 = arith.extui %0 : i1 to i32
    %c0_i32_0 = arith.constant 0 : i32
    %2 = arith.cmpi ne, %1, %c0_i32_0 : i32
    scf.if %2 {
      %cst_21 = arith.constant 0.000000e+00 : f32
      %31 = vector.broadcast %cst_21 : f32 to vector<1x128xf32>
      %c0_22 = arith.constant 0 : index
      %c0_23 = arith.constant 0 : index
      %c0_24 = arith.constant 0 : index
      %32 = vector.load %arg4[%c0_22, %c0_23, %c0_24] : memref<1x1x128xf32, #tpu.memory_space<vmem>>, vector<1x1x128xf32>
      %33 = vector.shape_cast %32 : vector<1x1x128xf32> to vector<1x128xf32>
      %34 = vector.shape_cast %31 : vector<1x128xf32> to vector<1x1x128xf32>
      tpu.vector_store %arg4[%c0_22, %c0_23, %c0_24], %34 {strides = array<i32>} : memref<1x1x128xf32, #tpu.memory_space<vmem>>, vector<1x1x128xf32>,
      %cst_25 = arith.constant 0.000000e+00 : f32
      %35 = vector.broadcast %cst_25 : f32 to vector<1x128xf32>
      %c0_26 = arith.constant 0 : index
      %c0_27 = arith.constant 0 : index
      %c0_28 = arith.constant 0 : index
      %36 = vector.load %arg5[%c0_26, %c0_27, %c0_28] : memref<1x1x128xf32, #tpu.memory_space<vmem>>, vector<1x1x128xf32>
      %37 = vector.shape_cast %36 : vector<1x1x128xf32> to vector<1x128xf32>
      %38 = vector.shape_cast %35 : vector<1x128xf32> to vector<1x1x128xf32>
      tpu.vector_store %arg5[%c0_26, %c0_27, %c0_28], %38 {strides = array<i32>} : memref<1x1x128xf32, #tpu.memory_space<vmem>>, vector<1x1x128xf32>,
    } else {
    }
    %c256_i32 = arith.constant 256 : i32
    %3 = arith.muli %arg1, %c256_i32 : i32
    %4 = tpu.assume_multiple %3, 8 : i32
    %cst = arith.constant 0.000000e+00 : f32
    %5 = vector.broadcast %cst : f32 to vector<256x128xf32>
    %c0_i32_1 = arith.constant 0 : i32
    %6 = arith.addi %4, %c0_i32_1 : i32
    %c0 = arith.constant 0 : index
    %7 = arith.index_cast %6 : i32 to index
    %c0_2 = arith.constant 0 : index
    %8 = vector.load %arg2[%c0, %7, %c0_2] : memref<1x256x36xbf16, #tpu.memory_space<vmem>>, vector<1x256x36xbf16>
    %9 = vector.shape_cast %8 : vector<1x256x36xbf16> to vector<256x36xbf16>
    %c0_3 = arith.constant 0 : index
    %c0_4 = arith.constant 0 : index
    %c0_5 = arith.constant 0 : index
    %10 = vector.load %arg3[%c0_3, %c0_4, %c0_5] : memref<1x36x128xbf16, #tpu.memory_space<vmem>>, vector<1x36x128xbf16>
    %11 = vector.shape_cast %10 : vector<1x36x128xbf16> to vector<36x128xbf16>
    %cst_6 = arith.constant dense<0.000000e+00> : vector<256x128xf32>
    %12 = tpu.matmul %9, %11, %cst_6 {dimension_numbers = #tpu.dot_dimension_numbers<[1], [0], [0], [1], [0, 0, 1, 1], [], []>} : vector<256x36xbf16>, vector<36x128xbf16>, vector<256x128xf32> -> vector<256x128xf32>
    %13 = arith.addf %5, %12 : vector<256x128xf32>
    %c0_7 = arith.constant 0 : index
    %c0_8 = arith.constant 0 : index
    %c0_9 = arith.constant 0 : index
    %14 = vector.load %arg4[%c0_7, %c0_8, %c0_9] : memref<1x1x128xf32, #tpu.memory_space<vmem>>, vector<1x1x128xf32>
    %15 = vector.shape_cast %14 : vector<1x1x128xf32> to vector<1x128xf32>
    %cst_10 = arith.constant dense<0.000000e+00> : vector<128xf32>
    %16 = vector.multi_reduction <add>, %13, %cst_10 [0] : vector<256x128xf32> to vector<128xf32>
    %17 = vector.shape_cast %16 : vector<128xf32> to vector<1x128xf32>
    %18 = arith.addf %15, %17 : vector<1x128xf32>
    %c0_11 = arith.constant 0 : index
    %c0_12 = arith.constant 0 : index
    %c0_13 = arith.constant 0 : index
    %19 = vector.load %arg4[%c0_11, %c0_12, %c0_13] : memref<1x1x128xf32, #tpu.memory_space<vmem>>, vector<1x1x128xf32>
    %20 = vector.shape_cast %19 : vector<1x1x128xf32> to vector<1x128xf32>
    %21 = vector.shape_cast %18 : vector<1x128xf32> to vector<1x1x128xf32>
    tpu.vector_store %arg4[%c0_11, %c0_12, %c0_13], %21 {strides = array<i32>} : memref<1x1x128xf32, #tpu.memory_space<vmem>>, vector<1x1x128xf32>,
    %c0_14 = arith.constant 0 : index
    %c0_15 = arith.constant 0 : index
    %c0_16 = arith.constant 0 : index
    %22 = vector.load %arg5[%c0_14, %c0_15, %c0_16] : memref<1x1x128xf32, #tpu.memory_space<vmem>>, vector<1x1x128xf32>
    %23 = vector.shape_cast %22 : vector<1x1x128xf32> to vector<1x128xf32>
    %24 = arith.mulf %13, %13 : vector<256x128xf32>
    %cst_17 = arith.constant dense<0.000000e+00> : vector<128xf32>
    %25 = vector.multi_reduction <add>, %24, %cst_17 [0] : vector<256x128xf32> to vector<128xf32>
    %26 = vector.shape_cast %25 : vector<128xf32> to vector<1x128xf32>
    %27 = arith.addf %23, %26 : vector<1x128xf32>
    %c0_18 = arith.constant 0 : index
    %c0_19 = arith.constant 0 : index
    %c0_20 = arith.constant 0 : index
    %28 = vector.load %arg5[%c0_18, %c0_19, %c0_20] : memref<1x1x128xf32, #tpu.memory_space<vmem>>, vector<1x1x128xf32>
    %29 = vector.shape_cast %28 : vector<1x1x128xf32> to vector<1x128xf32>
    %30 = vector.shape_cast %27 : vector<1x128xf32> to vector<1x1x128xf32>
    tpu.vector_store %arg5[%c0_18, %c0_19, %c0_20], %30 {strides = array<i32>} : memref<1x1x128xf32, #tpu.memory_space<vmem>>, vector<1x1x128xf32>,
    return
  }
  func.func @transform_0(%arg0: i32, %arg1: i32) -> (i32, i32, i32) {
    %c0_i32 = arith.constant 0 : i32
    %c0_i32_0 = arith.constant 0 : i32
    %c0_i32_1 = arith.constant 0 : i32
    return %arg0, %c0_i32, %c0_i32_0 : i32, i32, i32
  }
  func.func @transform_1(%arg0: i32, %arg1: i32) -> (i32, i32, i32) {
    %c0_i32 = arith.constant 0 : i32
    %c0_i32_0 = arith.constant 0 : i32
    %c0_i32_1 = arith.constant 0 : i32
    %c0_i32_2 = arith.constant 0 : i32
    return %c0_i32, %c0_i32_0, %c0_i32_1 : i32, i32, i32
  }
  func.func @transform_2(%arg0: i32, %arg1: i32) -> (i32, i32, i32) {
    %c0_i32 = arith.constant 0 : i32
    %c0_i32_0 = arith.constant 0 : i32
    %c0_i32_1 = arith.constant 0 : i32
    return %arg0, %c0_i32, %c0_i32_0 : i32, i32, i32
  }
  func.func @transform_3(%arg0: i32, %arg1: i32) -> (i32, i32, i32) {
    %c0_i32 = arith.constant 0 : i32
    %c0_i32_0 = arith.constant 0 : i32
    %c0_i32_1 = arith.constant 0 : i32
    return %arg0, %c0_i32, %c0_i32_0 : i32, i32, i32
  }
}

module attributes {stable_mosaic.version = 11 : i64} {
  func.func @conv_bn_relu_kernel(%arg0: i32, %arg1: i32, %arg2: memref<1x256x36xbf16, #tpu.memory_space<vmem>>, %arg3: memref<1x36x128xbf16, #tpu.memory_space<vmem>>, %arg4: memref<1x128xf32, #tpu.memory_space<vmem>>, %arg5: memref<1x128xf32, #tpu.memory_space<vmem>>, %arg6: memref<1x8x256xf32, #tpu.memory_space<vmem>>) attributes {dimension_semantics = [#tpu.dimension_semantics<parallel>, #tpu.dimension_semantics<parallel>], iteration_bounds = array<i64: 2, 1>, scalar_prefetch = 0 : i64, scratch_operands = 0 : i64, tpu.core_type = #tpu.core_type<tc>, window_params = [{transform_indices = @transform_0, window_bounds = array<i64: 1, 256, 36>}, {pipeline_mode = #tpu.pipeline_mode<synchronous>, transform_indices = @transform_1, window_bounds = array<i64: 1, 36, 128>}, {pipeline_mode = #tpu.pipeline_mode<synchronous>, transform_indices = @transform_2, window_bounds = array<i64: 1, 128>}, {pipeline_mode = #tpu.pipeline_mode<synchronous>, transform_indices = @transform_3, window_bounds = array<i64: 1, 128>}, {transform_indices = @transform_4, window_bounds = array<i64: 1, 8, 256>}]} {
    %c256_i32 = arith.constant 256 : i32
    %0 = arith.muli %arg1, %c256_i32 : i32
    %1 = tpu.assume_multiple %0, 8 : i32
    %cst = arith.constant 0.000000e+00 : f32
    %2 = vector.broadcast %cst : f32 to vector<256x128xf32>
    %c0_i32 = arith.constant 0 : i32
    %3 = arith.addi %1, %c0_i32 : i32
    %c0 = arith.constant 0 : index
    %4 = arith.index_cast %3 : i32 to index
    %c0_0 = arith.constant 0 : index
    %5 = vector.load %arg2[%c0, %4, %c0_0] : memref<1x256x36xbf16, #tpu.memory_space<vmem>>, vector<1x256x36xbf16>
    %6 = vector.shape_cast %5 : vector<1x256x36xbf16> to vector<256x36xbf16>
    %c0_1 = arith.constant 0 : index
    %c0_2 = arith.constant 0 : index
    %c0_3 = arith.constant 0 : index
    %7 = vector.load %arg3[%c0_1, %c0_2, %c0_3] : memref<1x36x128xbf16, #tpu.memory_space<vmem>>, vector<1x36x128xbf16>
    %8 = vector.shape_cast %7 : vector<1x36x128xbf16> to vector<36x128xbf16>
    %cst_4 = arith.constant dense<0.000000e+00> : vector<256x128xf32>
    %9 = tpu.matmul %6, %8, %cst_4 {dimension_numbers = #tpu.dot_dimension_numbers<[1], [0], [0], [1], [0, 0, 1, 1], [], []>} : vector<256x36xbf16>, vector<36x128xbf16>, vector<256x128xf32> -> vector<256x128xf32>
    %10 = arith.addf %2, %9 : vector<256x128xf32>
    %c0_5 = arith.constant 0 : index
    %c0_6 = arith.constant 0 : index
    %11 = vector.load %arg4[%c0_5, %c0_6] : memref<1x128xf32, #tpu.memory_space<vmem>>, vector<1x128xf32>
    %12 = vector.broadcast %11 : vector<1x128xf32> to vector<256x128xf32>
    %13 = arith.mulf %10, %12 : vector<256x128xf32>
    %c0_7 = arith.constant 0 : index
    %c0_8 = arith.constant 0 : index
    %14 = vector.load %arg5[%c0_7, %c0_8] : memref<1x128xf32, #tpu.memory_space<vmem>>, vector<1x128xf32>
    %15 = vector.broadcast %14 : vector<1x128xf32> to vector<256x128xf32>
    %16 = arith.addf %13, %15 : vector<256x128xf32>
    %cst_9 = arith.constant 0.000000e+00 : f32
    %17 = vector.broadcast %cst_9 : f32 to vector<256x128xf32>
    %18 = arith.maximumf %16, %17 : vector<256x128xf32>
    %19 = tpu.transpose %18, [1, 0] : vector<256x128xf32> -> vector<128x256xf32>
    %20 = vector.extract_strided_slice %19 {offsets = [0, 0], sizes = [8, 256], strides = [1, 1]} : vector<128x256xf32> to vector<8x256xf32>
    %c0_10 = arith.constant 0 : index
    %c0_11 = arith.constant 0 : index
    %c0_12 = arith.constant 0 : index
    %21 = vector.load %arg6[%c0_10, %c0_11, %c0_12] : memref<1x8x256xf32, #tpu.memory_space<vmem>>, vector<1x8x256xf32>
    %22 = vector.shape_cast %21 : vector<1x8x256xf32> to vector<8x256xf32>
    %23 = vector.shape_cast %20 : vector<8x256xf32> to vector<1x8x256xf32>
    tpu.vector_store %arg6[%c0_10, %c0_11, %c0_12], %23 {strides = array<i32>} : memref<1x8x256xf32, #tpu.memory_space<vmem>>, vector<1x8x256xf32>,
    return
  }
  func.func @transform_0(%arg0: i32, %arg1: i32) -> (i32, i32, i32) {
    %c0_i32 = arith.constant 0 : i32
    %c0_i32_0 = arith.constant 0 : i32
    %c0_i32_1 = arith.constant 0 : i32
    return %arg0, %c0_i32, %c0_i32_0 : i32, i32, i32
  }
  func.func @transform_1(%arg0: i32, %arg1: i32) -> (i32, i32, i32) {
    %c0_i32 = arith.constant 0 : i32
    %c0_i32_0 = arith.constant 0 : i32
    %c0_i32_1 = arith.constant 0 : i32
    %c0_i32_2 = arith.constant 0 : i32
    return %c0_i32, %c0_i32_0, %c0_i32_1 : i32, i32, i32
  }
  func.func @transform_2(%arg0: i32, %arg1: i32) -> (i32, i32) {
    %c0_i32 = arith.constant 0 : i32
    %c0_i32_0 = arith.constant 0 : i32
    %c0_i32_1 = arith.constant 0 : i32
    return %c0_i32, %c0_i32_0 : i32, i32
  }
  func.func @transform_3(%arg0: i32, %arg1: i32) -> (i32, i32) {
    %c0_i32 = arith.constant 0 : i32
    %c0_i32_0 = arith.constant 0 : i32
    %c0_i32_1 = arith.constant 0 : i32
    return %c0_i32, %c0_i32_0 : i32, i32
  }
  func.func @transform_4(%arg0: i32, %arg1: i32) -> (i32, i32, i32) {
    %c0_i32 = arith.constant 0 : i32
    %c0_i32_0 = arith.constant 0 : i32
    return %arg0, %c0_i32, %arg1 : i32, i32, i32
  }
}

</mosaic_0001>

<bundles_post_ra>
// kernel: conv_bn_relu.3
= control target key start
LH: loop header
LB: loop body
LE: loop exit
PB: predicated region body
PF: predicated region fallthrough
CT: control target
= control target key end

     0   :  { %s1039_s15 = smov 0   ;;  %s1041_s16 = smov 0   ;;  %s1199_s0 = inlined_call_operand.vmem [shape: bf16[2,256,36], index: 0, kind: input, shape index: {}]   ;;  %s1200_s1 = inlined_call_operand.vmem [shape: bf16[1,36,128], index: 1, kind: input, shape index: {}]   ;;  %s1201_s2 = inlined_call_operand.vmem [shape: f32[1,128], index: 2, kind: input, shape index: {}]   ;;  %s1202_s3 = inlined_call_operand.vmem [shape: f32[1,128], index: 3, kind: input, shape index: {}]   ;;  %s1203_s4 = inlined_call_operand.vmem [shape: f32[2,8,256], index: 4, kind: output, shape index: {}]  }
   0x1   :  { %s1043_s17 = smov 0  }
   0x2 LB: > { %s26_s18 = sadd.s32 1, %s1008_s16  ;;  %p836_p0 = scmp.ge.s32.totalorder %s1012_s17, 1  ;;  %s1012_s17 = sphi %s1043_s17, %s14_s17   ;;  %s1008_s16 = sphi %s1041_s16, %s1205_s16   ;;  %s1004_s15 = sphi %s1039_s15, %s1204_s15  }
   0x3   : > { %p28_p1 = scmp.ge.s32.totalorder %s26_s18, 2  ;;  %p176_p2 = scmp.lt.s32.totalorder %s1012_s17, 3 }
   0x5   : > { %s1207_s18 = smov (%p28_p1, %s26_s18), 0  ;;  %p177_p3 = pnand %p836_p0, %p176_p2 }
   0x6   : > { %v971_v0 = vld [vmem:[%s1200_s1] sm:$0xff] (!%p177_p3)   ;;  %v972_v1 = vld [vmem:[%s1200_s1 + $0x8] sm:$0xff] (!%p177_p3)   ;;  %p206_p4 = scmp.lt.s32.totalorder (!%p177_p3), %s1004_s15, 1  ;;  %v973_v2 = vld [vmem:[%s1200_s1 + $0x10] ss:$0 sps:$4 sm:$0x33] (!%p177_p3)  }
   0x7   : > { %180 = sbr.rel (%p177_p3) target bundleno = 369 (0x171), region = 36  ;;  %901 = vmatprep.subr.bf16.mxu0 (!%p177_p3), %v971_v0  ;;  %939 = vmatprep.subr.bf16.mxu1 (!%p177_p3), %v971_v0  ;;  %vm408_vm0 = vcmask (!%p177_p3), 1041408   ;;  %vm359_vm1 = vcmask (!%p177_p3), 293888   ;;  %v1109_v20 = vld [vmem:[%s1201_s2] ss:$0 sm:$0xff] (!%p177_p3) }
   0x8   : > { %902 = vmatpush3.bf16.msra.mxu0 (!%p177_p3), %v971_v0  ;;  %942 = vmatpush3.bf16.msra.mxu1 (!%p177_p3), %v971_v0  ;;  %v410_v4 = vsel (!%p177_p3), %vm408_vm0, %v973_v2, 0  ;;  %v1114_v25 = vld [vmem:[%s1202_s3] ss:$0 sm:$0xff] (!%p177_p3) }
   0x9   : > { %903 = vmatprep.subr.bf16.mxu0 (!%p177_p3), %v972_v1  ;;  %940 = vmatprep.subr.bf16.mxu1 (!%p177_p3), %v972_v1 }
   0xc   : > { %904 = vmatpush3.bf16.msra.mxu0 (!%p177_p3), %v972_v1  ;;  %943 = vmatpush3.bf16.msra.mxu1 (!%p177_p3), %v972_v1 }
   0xd   : > { %945 = vmatprep.subr.msk.bf16.mxu0 (!%p177_p3), %vm408_vm0, %v973_v2  ;;  %946 = vmatprep.subr.msk.bf16.mxu1 (!%p177_p3), %vm408_vm0, %v973_v2 }
   0xe   : > { %s1209_s15 = smov (!%p206_p4, %s1004_s15), 1 }
   0xf   : > { %s880_s25 = sshll.u32 %s1209_s15, 7  ;;  %s881_s7 = sshll.u32 %s1209_s15, 4 }
  0x10   : > { %s1072_s28 = scalar_lea.vmem %s1199_s0, %s880_s25  ;;  %906 = vmatpush3.bf16.msra.mxu0 %v410_v4  ;;  %944 = vmatpush3.bf16.msra.mxu1 %v410_v4  ;;  %s219_s10 = scalar_lea.vmem %s1203_s4, %s881_s7 }
  0x11   : > { %v974_v3 = vld [vmem:[%s1072_s28] sm:$0xff]   ;;  %v976_v6 = vld [vmem:[%s1072_s28 + $0x8] sm:$0xff]   ;;  %v978_v8 = vld [vmem:[%s1072_s28 + $0x10] sm:$0xff]  }
  0x12   : > { %v975_v5 = vld [vmem:[%s1072_s28 + $0x40] sm:$0xff]   ;;  %907 = vmatprep.mubr.msk.bf16.mxu0 %vm359_vm1, %v974_v3  ;;  %v977_v7 = vld [vmem:[%s1072_s28 + $0x48] sm:$0xff]   ;;  %v979_v9 = vld [vmem:[%s1072_s28 + $0x50] sm:$0xff]  }
  0x13   : > { %923 = vmatprep.mubr.msk.bf16.mxu1 %vm359_vm1, %v975_v5  ;;  %908 = vmatmul.mubr.msk.bf16.vlgmr.msra.gmra.mrb[0].mxu0 %vm359_vm1, %v976_v6  ;;  %v980_v10 = vld [vmem:[%s1072_s28 + $0x18] sm:$0xff]   ;;  %v982_v12 = vld [vmem:[%s1072_s28 + $0x20] sm:$0xff]   ;;  %v984_v14 = vld [vmem:[%s1072_s28 + $0x28] sm:$0xff]  }
  0x14   : > { %924 = vmatmul.mubr.msk.bf16.vlgmr.msra.gmra.mrb[0].mxu1 %vm359_vm1, %v977_v7  ;;  %911 = vmatprep.mubr.msk.bf16.mxu0 %vm359_vm1, %v978_v8  ;;  %v981_v11 = vld [vmem:[%s1072_s28 + $0x58] sm:$0xff]   ;;  %v983_v13 = vld [vmem:[%s1072_s28 + $0x60] sm:$0xff]   ;;  %v985_v15 = vld [vmem:[%s1072_s28 + $0x68] sm:$0xff]  }
  0x15   : > { %927 = vmatprep.mubr.msk.bf16.mxu1 %vm359_vm1, %v979_v9  ;;  %v986_v16 = vld [vmem:[%s1072_s28 + $0x30] sm:$0xff]   ;;  %v988_v18 = vld [vmem:[%s1072_s28 + $0x38] sm:$0xff]  }
  0x16   : > { %v987_v17 = vld [vmem:[%s1072_s28 + $0x70] sm:$0xff]   ;;  %v989_v19 = vld [vmem:[%s1072_s28 + $0x78] sm:$0xff]  }
  0x1b   : > { %912 = vmatmul.mubr.msk.bf16.gmra.mrb[4].mxu0 %vm359_vm1, %v980_v10 }
  0x1c   : > { %928 = vmatmul.mubr.msk.bf16.gmra.mrb[4].mxu1 %vm359_vm1, %v981_v11  ;;  %915 = vmatprep.mubr.msk.bf16.mxu0 %vm359_vm1, %v982_v12 }
  0x1d   : > { %931 = vmatprep.mubr.msk.bf16.mxu1 %vm359_vm1, %v983_v13 }
  0x23   : > { %916 = vmatmul.mubr.msk.bf16.gmra.mrb[8].mxu0 %vm359_vm1, %v984_v14 }
  0x24   : > { %932 = vmatmul.mubr.msk.bf16.gmra.mrb[8].mxu1 %vm359_vm1, %v985_v15  ;;  %919 = vmatprep.mubr.msk.bf16.mxu0 %vm359_vm1, %v986_v16 }
  0x25   : > { %935 = vmatprep.mubr.msk.bf16.mxu1 %vm359_vm1, %v987_v17 }
  0x2b   : > { %920 = vmatmul.mubr.msk.bf16.gmra.mrb[12].mxu0 %vm359_vm1, %v988_v18 }
  0x2c   : > { %936 = vmatmul.mubr.msk.bf16.gmra.mrb[12].mxu1 %vm359_vm1, %v989_v19 }
  0xe6   : > { %v909_v21 = vpop.f32.mrb[0].mxu0 }
  0xe7   : > { %v925_v22 = vpop.f32.mrb[0].mxu1  ;;  %v446_v23 = vpop.f32.mrb[1].mxu0  ;;  %v582_v36 = vmul.f32 %v909_v21, %v1109_v20 }
  0xe8   : > { %v510_v24 = vpop.f32.mrb[1].mxu1  ;;  %v580_v26 = vmul.f32 %v1109_v20, %v446_v23  ;;  %v910_v28 = vpop.f32.mrb[2].mxu0  ;;  %v598_v37 = vmul.f32 %v925_v22, %v1109_v20 }
  0xe9   : > { %v596_v27 = vmul.f32 %v1109_v20, %v510_v24  ;;  %v926_v29 = vpop.f32.mrb[2].mxu1  ;;  %v449_v30 = vpop.f32.mrb[3].mxu0  ;;  %v583_v44 = vmul.f32 %v910_v28, %v1109_v20  ;;  %v621_v53 = vadd.f32 %v1114_v25, %v582_v36 }
  0xea   : > { %v513_v31 = vpop.f32.mrb[3].mxu1  ;;  %v581_v32 = vmul.f32 %v1109_v20, %v449_v30  ;;  %v619_v35 = vadd.f32 %v1114_v25, %v580_v26  ;;  %v599_v45 = vmul.f32 %v926_v29, %v1109_v20  ;;  %v637_v52 = vadd.f32 %v1114_v25, %v598_v37 }
  0xeb   : > { %v597_v33 = vmul.f32 %v1109_v20, %v513_v31  ;;  %v635_v34 = vadd.f32 %v1114_v25, %v596_v27  ;;  %v653_v59 = vmax.f32 %v621_v53, 0.0  ;;  %v622_v61 = vadd.f32 %v1114_v25, %v583_v44 }
  0xec   : > { %v651_v39 = vmax.f32 %v619_v35, 0.0  ;;  %v620_v41 = vadd.f32 %v1114_v25, %v581_v32  ;;  %v669_v58 = vmax.f32 %v637_v52, 0.0  ;;  %v638_v60 = vadd.f32 %v1114_v25, %v599_v45 }
  0xed   : > { %v667_v38 = vmax.f32 %v635_v34, 0.0  ;;  %v636_v40 = vadd.f32 %v1114_v25, %v597_v33  ;;  %v654_v7 = vmax.f32 %v622_v61, 0.0 }
  0xee   : > { %683 = vxpose.xlu0.b32.start [1/16] (narrow) %v651_v39, 8  ;;  %v913_v42 = vpop.f32.mrb[4].mxu0  ;;  %v652_v49 = vmax.f32 %v620_v41, 0.0  ;;  %v670_v6 = vmax.f32 %v638_v60, 0.0 }
  0xef   : > { %715 = vxpose.xlu1.b32.start [1/16] (narrow) %v667_v38, 8  ;;  %v929_v43 = vpop.f32.mrb[4].mxu1  ;;  %v462_v46 = vpop.f32.mrb[5].mxu0  ;;  %v668_v48 = vmax.f32 %v636_v40, 0.0  ;;  %v586_v14 = vmul.f32 %v913_v42, %v1109_v20 }
  0xf0   : > { %v526_v47 = vpop.f32.mrb[5].mxu1  ;;  %v914_v50 = vpop.f32.mrb[6].mxu0  ;;  %v584_v56 = vmul.f32 %v1109_v20, %v462_v46  ;;  %v602_v15 = vmul.f32 %v929_v43, %v1109_v20 }
  0xf1   : > { %v930_v51 = vpop.f32.mrb[6].mxu1  ;;  %v465_v55 = vpop.f32.mrb[7].mxu0  ;;  %v600_v57 = vmul.f32 %v1109_v20, %v526_v47  ;;  %v587_v21 = vmul.f32 %v914_v50, %v1109_v20  ;;  %v625_v29 = vadd.f32 %v1114_v25, %v586_v14 }
  0xf2   : > { %v529_v54 = vpop.f32.mrb[7].mxu1  ;;  %684 = vxpose.xlu0.b32.cont [2/16] (narrow) %v652_v49, 8  ;;  %v623_v63 = vadd.f32 %v1114_v25, %v584_v56  ;;  %v585_v5 = vmul.f32 %v1109_v20, %v465_v55  ;;  %v603_v22 = vmul.f32 %v930_v51, %v1109_v20  ;;  %v641_v28 = vadd.f32 %v1114_v25, %v602_v15 }
  0xf3   : > { %716 = vxpose.xlu1.b32.cont [2/16] (narrow) %v668_v48, 8  ;;  %v639_v62 = vadd.f32 %v1114_v25, %v600_v57  ;;  %v601_v4 = vmul.f32 %v1109_v20, %v529_v54  ;;  %v657_v37 = vmax.f32 %v625_v29, 0.0  ;;  %v626_v39 = vadd.f32 %v1114_v25, %v587_v21 }
  0xf4   : > { %v655_v13 = vmax.f32 %v623_v63, 0.0  ;;  %v624_v17 = vadd.f32 %v1114_v25, %v585_v5  ;;  %v673_v36 = vmax.f32 %v641_v28, 0.0  ;;  %v642_v38 = vadd.f32 %v1114_v25, %v603_v22 }
  0xf5   : > { %v671_v12 = vmax.f32 %v639_v62, 0.0  ;;  %v640_v16 = vadd.f32 %v1114_v25, %v601_v4  ;;  %v658_v45 = vmax.f32 %v626_v39, 0.0 }
  0xf6   : > { %685 = vxpose.xlu0.b32.cont [3/16] (narrow) %v653_v59, 8  ;;  %v917_v0 = vpop.f32.mrb[8].mxu0  ;;  %v656_v27 = vmax.f32 %v624_v17, 0.0  ;;  %v674_v44 = vmax.f32 %v642_v38, 0.0 }
  0xf7   : > { %717 = vxpose.xlu1.b32.cont [3/16] (narrow) %v669_v58, 8  ;;  %v933_v1 = vpop.f32.mrb[8].mxu1  ;;  %v478_v2 = vpop.f32.mrb[9].mxu0  ;;  %v672_v26 = vmax.f32 %v640_v16, 0.0  ;;  %v590_v48 = vmul.f32 %v917_v0, %v1109_v20 }
  0xf8   : > { %v542_v3 = vpop.f32.mrb[9].mxu1  ;;  %v918_v8 = vpop.f32.mrb[10].mxu0  ;;  %v588_v34 = vmul.f32 %v1109_v20, %v478_v2  ;;  %v606_v49 = vmul.f32 %v933_v1, %v1109_v20 }
  0xf9   : > { %v934_v9 = vpop.f32.mrb[10].mxu1  ;;  %v481_v11 = vpop.f32.mrb[11].mxu0  ;;  %v604_v35 = vmul.f32 %v1109_v20, %v542_v3  ;;  %v591_v52 = vmul.f32 %v918_v8, %v1109_v20  ;;  %v629_v57 = vadd.f32 %v1114_v25, %v590_v48 }
  0xfa   : > { %v545_v10 = vpop.f32.mrb[11].mxu1  ;;  %686 = vxpose.xlu0.b32.cont [4/16] (narrow) %v654_v7, 8  ;;  %v627_v41 = vadd.f32 %v1114_v25, %v588_v34  ;;  %v589_v43 = vmul.f32 %v1109_v20, %v481_v11  ;;  %v607_v53 = vmul.f32 %v934_v9, %v1109_v20  ;;  %v645_v56 = vadd.f32 %v1114_v25, %v606_v49 }
  0xfb   : > { %718 = vxpose.xlu1.b32.cont [4/16] (narrow) %v670_v6, 8  ;;  %v643_v40 = vadd.f32 %v1114_v25, %v604_v35  ;;  %v605_v42 = vmul.f32 %v1109_v20, %v545_v10  ;;  %v661_v61 = vmax.f32 %v629_v57, 0.0  ;;  %v630_v63 = vadd.f32 %v1114_v25, %v591_v52 }
  0xfc   : > { %v659_v47 = vmax.f32 %v627_v41, 0.0  ;;  %v628_v51 = vadd.f32 %v1114_v25, %v589_v43  ;;  %v677_v60 = vmax.f32 %v645_v56, 0.0  ;;  %v646_v62 = vadd.f32 %v1114_v25, %v607_v53 }
  0xfd   : > { %v675_v46 = vmax.f32 %v643_v40, 0.0  ;;  %v644_v50 = vadd.f32 %v1114_v25, %v605_v42  ;;  %v662_v5 = vmax.f32 %v630_v63, 0.0 }
  0xfe   : > { %687 = vxpose.xlu0.b32.cont [5/16] (narrow) %v655_v13, 8  ;;  %v1142_v18 = vpop.f32.mrb[12].mxu0  ;;  %v660_v55 = vmax.f32 %v628_v51, 0.0  ;;  %v678_v4 = vmax.f32 %v646_v62, 0.0 }
  0xff   : > { %719 = vxpose.xlu1.b32.cont [5/16] (narrow) %v671_v12, 8  ;;  %v1144_v19 = vpop.f32.mrb[12].mxu1  ;;  %v494_v23 = vpop.f32.mrb[13].mxu0  ;;  %v676_v54 = vmax.f32 %v644_v50, 0.0  ;;  %v594_v8 = vmul.f32 %v1142_v18, %v1109_v20 }
 0x100   : > { %v558_v24 = vpop.f32.mrb[13].mxu1  ;;  %v922_v30 = vpop.f32.mrb[14].mxu0  ;;  %v592_v58 = vmul.f32 %v1109_v20, %v494_v23  ;;  %v610_v9 = vmul.f32 %v1144_v19, %v1109_v20 }
 0x101   : > { %v938_v31 = vpop.f32.mrb[14].mxu1  ;;  %v497_v33 = vpop.f32.mrb[15].mxu0  ;;  %v608_v59 = vmul.f32 %v1109_v20, %v558_v24  ;;  %v595_v12 = vmul.f32 %v922_v30, %v1109_v20  ;;  %v633_v17 = vadd.f32 %v1114_v25, %v594_v8 }
 0x102   : > { %v561_v32 = vpop.f32.mrb[15].mxu1  ;;  %688 = vxpose.xlu0.b32.cont [6/16] (narrow) %v656_v27, 8  ;;  %v631_v1 = vadd.f32 %v1114_v25, %v592_v58  ;;  %v593_v3 = vmul.f32 %v1109_v20, %v497_v33  ;;  %v611_v13 = vmul.f32 %v938_v31, %v1109_v20  ;;  %v649_v16 = vadd.f32 %v1114_v25, %v610_v9 }
 0x103   : > { %720 = vxpose.xlu1.b32.cont [6/16] (narrow) %v672_v26, 8  ;;  %v647_v0 = vadd.f32 %v1114_v25, %v608_v59  ;;  %v609_v2 = vmul.f32 %v1109_v20, %v561_v32  ;;  %v665_v19 = vmax.f32 %v633_v17, 0.0  ;;  %v634_v22 = vadd.f32 %v1114_v25, %v595_v12 }
 0x104   : > { %v663_v7 = vmax.f32 %v631_v1, 0.0  ;;  %v632_v11 = vadd.f32 %v1114_v25, %v593_v3  ;;  %v681_v18 = vmax.f32 %v649_v16, 0.0  ;;  %v650_v21 = vadd.f32 %v1114_v25, %v611_v13 }
 0x105   : > { %v679_v6 = vmax.f32 %v647_v0, 0.0  ;;  %v648_v10 = vadd.f32 %v1114_v25, %v609_v2  ;;  %v666_v24 = vmax.f32 %v634_v22, 0.0 }
 0x106   : > { %689 = vxpose.xlu0.b32.cont [7/16] (narrow) %v657_v37, 8  ;;  %v664_v15 = vmax.f32 %v632_v11, 0.0  ;;  %v682_v23 = vmax.f32 %v650_v21, 0.0 }
 0x107   : > { %721 = vxpose.xlu1.b32.cont [7/16] (narrow) %v673_v36, 8  ;;  %v680_v14 = vmax.f32 %v648_v10, 0.0 }
 0x10a   : > { %690 = vxpose.xlu0.b32.cont [8/16] (narrow) %v658_v45, 8 }
 0x10b   : > { %722 = vxpose.xlu1.b32.cont [8/16] (narrow) %v674_v44, 8 }
 0x10e   : > { %691 = vxpose.xlu0.b32.cont [9/16] (narrow) %v659_v47, 8 }
 0x10f   : > { %723 = vxpose.xlu1.b32.cont [9/16] (narrow) %v675_v46, 8 }
 0x112   : > { %692 = vxpose.xlu0.b32.cont [10/16] (narrow) %v660_v55, 8 }
 0x113   : > { %724 = vxpose.xlu1.b32.cont [10/16] (narrow) %v676_v54, 8 }
 0x116   : > { %693 = vxpose.xlu0.b32.cont [11/16] (narrow) %v661_v61, 8 }
 0x117   : > { %725 = vxpose.xlu1.b32.cont [11/16] (narrow) %v677_v60, 8 }
 0x11a   : > { %694 = vxpose.xlu0.b32.cont [12/16] (narrow) %v662_v5, 8 }
 0x11b   : > { %726 = vxpose.xlu1.b32.cont [12/16] (narrow) %v678_v4, 8 }
 0x11e   : > { %695 = vxpose.xlu0.b32.cont [13/16] (narrow) %v663_v7, 8 }
 0x11f   : > { %727 = vxpose.xlu1.b32.cont [13/16] (narrow) %v679_v6, 8 }
 0x122   : > { %696 = vxpose.xlu0.b32.cont [14/16] (narrow) %v664_v15, 8 }
 0x123   : > { %728 = vxpose.xlu1.b32.cont [14/16] (narrow) %v680_v14, 8 }
 0x126   : > { %697 = vxpose.xlu0.b32.cont [15/16] (narrow) %v665_v19, 8 }
 0x127   : > { %729 = vxpose.xlu1.b32.cont [15/16] (narrow) %v681_v18, 8 }
 0x12a   : > { %698 = vxpose.xlu0.b32.end [16/16] (narrow) %v666_v24, 8 }
 0x12b   : > { %730 = vxpose.xlu1.b32.end [16/16] (narrow) %v682_v23, 8 }
 0x16e   : > { %v699_v26 = vpop.trf.xlu0 }
 0x16f   : > { %v731_v20 = vpop.trf.xlu1  ;;  %747 = vst [vmem:[%s219_s10] sm:$0xff] %v699_v26 }
 0x170   : > { %748 = vst [vmem:[%s219_s10 + $0x8] sm:$0xff] %v731_v20 }
 0x171 PF: > { %s14_s17 = sadd.s32 1, %s1012_s17   ;;  %s1204_s15 = smov %s1008_s16 }
 0x172   : > { %p11_p5 = scmp.ge.s32.totalorder %s14_s17, 4   ;;  %s1205_s16 = smov %s1207_s18 }
 0x174   :  { %13 = sbr.rel (!%p11_p5) target bundleno = 2 (0x2), region = 67 }

// kernel: conv_bn_relu.2
= control target key start
LH: loop header
LB: loop body
LE: loop exit
PB: predicated region body
PF: predicated region fallthrough
CT: control target
= control target key end

     0   :  { %s939_s12 = smov 0   ;;  %s941_s13 = smov 0   ;;  %s1063_s0 = inlined_call_operand.vmem [shape: bf16[2,256,36], index: 0, kind: input, shape index: {}]   ;;  %s1064_s1 = inlined_call_operand.vmem [shape: bf16[1,36,128], index: 1, kind: input, shape index: {}]   ;;  %s1065_s2 = inlined_call_operand.vmem [shape: f32[2,1,128], index: 2, kind: output, shape index: {0}]   ;;  %s1066_s3 = inlined_call_operand.vmem [shape: f32[2,1,128], index: 3, kind: output, shape index: {1}]  }
   0x1   :  { %s943_s14 = smov 0  }
   0x2 LB: > { %s26_s15 = sadd.s32 1, %s912_s13  ;;  %p744_p0 = scmp.ge.s32.totalorder %s916_s14, 1  ;;  %s916_s14 = sphi %s943_s14, %s14_s14   ;;  %s912_s13 = sphi %s941_s13, %s1068_s13   ;;  %s908_s12 = sphi %s939_s12, %s1067_s12  }
   0x3   : > { %p28_p1 = scmp.ge.s32.totalorder %s26_s15, 2  ;;  %p152_p2 = scmp.lt.s32.totalorder %s916_s14, 3 }
   0x5   : > { %s1070_s15 = smov (%p28_p1, %s26_s15), 0  ;;  %p153_p3 = pnand %p744_p0, %p152_p2 }
   0x6   : > { %v875_v0 = vld [vmem:[%s1064_s1] sm:$0xff] (!%p153_p3)   ;;  %v876_v1 = vld [vmem:[%s1064_s1 + $0x8] sm:$0xff] (!%p153_p3)   ;;  %p177_p4 = scmp.lt.s32.totalorder (!%p153_p3), %s908_s12, 1  ;;  %v877_v2 = vld [vmem:[%s1064_s1 + $0x10] ss:$0 sps:$4 sm:$0x33] (!%p153_p3)  }
   0x7   : > { %156 = sbr.rel (%p153_p3) target bundleno = 313 (0x139), region = 28  ;;  %804 = vmatprep.subr.bf16.mxu0 (!%p153_p3), %v875_v0  ;;  %842 = vmatprep.subr.bf16.mxu1 (!%p153_p3), %v875_v0  ;;  %vm381_vm0 = vcmask (!%p153_p3), 1041408   ;;  %vm332_vm1 = vcmask (!%p153_p3), 293888   ;;  %v918_v20 = vmov (!%p153_p3), 0.0  }
   0x8   : > { %805 = vmatpush3.bf16.msra.mxu0 (!%p153_p3), %v875_v0  ;;  %845 = vmatpush3.bf16.msra.mxu1 (!%p153_p3), %v875_v0  ;;  %v383_v4 = vsel (!%p153_p3), %vm381_vm0, %v877_v2, 0 }
   0x9   : > { %806 = vmatprep.subr.bf16.mxu0 (!%p153_p3), %v876_v1  ;;  %843 = vmatprep.subr.bf16.mxu1 (!%p153_p3), %v876_v1 }
   0xc   : > { %807 = vmatpush3.bf16.msra.mxu0 (!%p153_p3), %v876_v1  ;;  %846 = vmatpush3.bf16.msra.mxu1 (!%p153_p3), %v876_v1 }
   0xd   : > { %848 = vmatprep.subr.msk.bf16.mxu0 (!%p153_p3), %vm381_vm0, %v877_v2  ;;  %849 = vmatprep.subr.msk.bf16.mxu1 (!%p153_p3), %vm381_vm0, %v877_v2 }
   0xe   : > { %s1072_s12 = smov (!%p177_p4, %s908_s12), 1 }
   0xf   : > { %s784_s22 = sshll.u32 %s1072_s12, 7  ;;  %s1010_s28 = scalar_lea.vmem %s1065_s2, %s1072_s12 }
  0x10   : > { %s972_s25 = scalar_lea.vmem %s1063_s0, %s784_s22  ;;  %809 = vmatpush3.bf16.msra.mxu0 %v383_v4  ;;  %847 = vmatpush3.bf16.msra.mxu1 %v383_v4  ;;  %s1016_s4 = scalar_lea.vmem %s1066_s3, %s1072_s12  ;;  %193 = vst [vmem:[%s1010_s28] sm:$0x1] %v918_v20 }
  0x11   : > { %v878_v3 = vld [vmem:[%s972_s25] sm:$0xff]   ;;  %v879_v5 = vld [vmem:[%s972_s25 + $0x8] sm:$0xff]   ;;  %v880_v6 = vld [vmem:[%s972_s25 + $0x10] sm:$0xff]   ;;  %194 = vst [vmem:[%s1016_s4] sm:$0x1] %v918_v20 }
  0x12   : > { %810 = vmatprep.mubr.msk.bf16.mxu0 %vm332_vm1, %v878_v3  ;;  %v886_v7 = vld [vmem:[%s972_s25 + $0x40] sm:$0xff]   ;;  %v887_v8 = vld [vmem:[%s972_s25 + $0x48] sm:$0xff]   ;;  %v888_v9 = vld [vmem:[%s972_s25 + $0x50] sm:$0xff]  }
  0x13   : > { %811 = vmatmul.mubr.msk.bf16.vlgmr.msra.gmra.mrb[0].mxu0 %vm332_vm1, %v879_v5  ;;  %826 = vmatprep.mubr.msk.bf16.mxu1 %vm332_vm1, %v886_v7  ;;  %v881_v10 = vld [vmem:[%s972_s25 + $0x18] sm:$0xff]   ;;  %v882_v11 = vld [vmem:[%s972_s25 + $0x20] sm:$0xff]   ;;  %v883_v14 = vld [vmem:[%s972_s25 + $0x28] sm:$0xff]  }
  0x14   : > { %814 = vmatprep.mubr.msk.bf16.mxu0 %vm332_vm1, %v880_v6  ;;  %827 = vmatmul.mubr.msk.bf16.vlgmr.msra.gmra.mrb[0].mxu1 %vm332_vm1, %v887_v8  ;;  %v889_v12 = vld [vmem:[%s972_s25 + $0x58] sm:$0xff]   ;;  %v890_v13 = vld [vmem:[%s972_s25 + $0x60] sm:$0xff]   ;;  %v884_v15 = vld [vmem:[%s972_s25 + $0x30] sm:$0xff]  }
  0x15   : > { %830 = vmatprep.mubr.msk.bf16.mxu1 %vm332_vm1, %v888_v9  ;;  %v891_v16 = vld [vmem:[%s972_s25 + $0x68] sm:$0xff]   ;;  %v892_v17 = vld [vmem:[%s972_s25 + $0x70] sm:$0xff]   ;;  %v885_v18 = vld [vmem:[%s972_s25 + $0x38] sm:$0xff]  }
  0x16   : > { %v893_v19 = vld [vmem:[%s972_s25 + $0x78] sm:$0xff]  }
  0x1b   : > { %815 = vmatmul.mubr.msk.bf16.gmra.mrb[4].mxu0 %vm332_vm1, %v881_v10 }
  0x1c   : > { %818 = vmatprep.mubr.msk.bf16.mxu0 %vm332_vm1, %v882_v11  ;;  %831 = vmatmul.mubr.msk.bf16.gmra.mrb[4].mxu1 %vm332_vm1, %v889_v12 }
  0x1d   : > { %834 = vmatprep.mubr.msk.bf16.mxu1 %vm332_vm1, %v890_v13 }
  0x23   : > { %819 = vmatmul.mubr.msk.bf16.gmra.mrb[8].mxu0 %vm332_vm1, %v883_v14 }
  0x24   : > { %822 = vmatprep.mubr.msk.bf16.mxu0 %vm332_vm1, %v884_v15  ;;  %835 = vmatmul.mubr.msk.bf16.gmra.mrb[8].mxu1 %vm332_vm1, %v891_v16 }
  0x25   : > { %838 = vmatprep.mubr.msk.bf16.mxu1 %vm332_vm1, %v892_v17 }
  0x2b   : > { %823 = vmatmul.mubr.msk.bf16.gmra.mrb[12].mxu0 %vm332_vm1, %v885_v18 }
  0x2c   : > { %839 = vmatmul.mubr.msk.bf16.gmra.mrb[12].mxu1 %vm332_vm1, %v893_v19 }
  0xe6   : > { %v812_v21 = vpop.f32.mrb[0].mxu0 }
  0xe7   : > { %v419_v22 = vpop.f32.mrb[1].mxu0  ;;  %v1020_v28 = vpop.f32.mrb[0].mxu1  ;;  %v589_v30 = vmul.f32 %v812_v21, %v812_v21 }
  0xe8   : > { %v813_v23 = vpop.f32.mrb[2].mxu0  ;;  %v587_v25 = vmul.f32 %v419_v22, %v419_v22  ;;  %v1022_v29 = vpop.f32.mrb[1].mxu1 }
  0xe9   : > { %v422_v24 = vpop.f32.mrb[3].mxu0  ;;  %v1024_v33 = vpop.f32.mrb[2].mxu1  ;;  %v590_v35 = vmul.f32 %v813_v23, %v813_v23 }
  0xea   : > { %v547_v26 = vadd.f32 %v422_v24, %v419_v22  ;;  %v588_v27 = vmul.f32 %v422_v24, %v422_v24  ;;  %v1026_v34 = vpop.f32.mrb[3].mxu1 }
  0xec   : > { %v548_v31 = vadd.f32 %v812_v21, %v547_v26  ;;  %v619_v32 = vadd.f32 %v588_v27, %v587_v25 }
  0xee   : > { %v620_v36 = vadd.f32 %v619_v32, %v589_v30  ;;  %v816_v37 = vpop.f32.mrb[4].mxu0  ;;  %v549_v38 = vadd.f32 %v813_v23, %v548_v31 }
  0xef   : > { %v435_v39 = vpop.f32.mrb[5].mxu0  ;;  %v1028_v48 = vpop.f32.mrb[4].mxu1  ;;  %v593_v50 = vmul.f32 %v816_v37, %v816_v37 }
  0xf0   : > { %v550_v40 = vadd.f32 %v549_v38, %v435_v39  ;;  %v591_v41 = vmul.f32 %v435_v39, %v435_v39  ;;  %v621_v42 = vadd.f32 %v620_v36, %v590_v35  ;;  %v817_v43 = vpop.f32.mrb[6].mxu0  ;;  %v499_v49 = vpop.f32.mrb[5].mxu1  ;;  %v603_v38 = vmul.f32 %v1022_v29, %v1022_v29 }
  0xf1   : > { %v438_v44 = vpop.f32.mrb[7].mxu0  ;;  %v1030_v53 = vpop.f32.mrb[6].mxu1  ;;  %v594_v55 = vmul.f32 %v817_v43, %v817_v43 }
  0xf2   : > { %v622_v45 = vadd.f32 %v621_v42, %v591_v41  ;;  %v551_v46 = vadd.f32 %v550_v40, %v438_v44  ;;  %v592_v47 = vmul.f32 %v438_v44, %v438_v44  ;;  %v502_v54 = vpop.f32.mrb[7].mxu1  ;;  %v605_v44 = vmul.f32 %v1020_v28, %v1020_v28 }
  0xf4   : > { %v552_v51 = vadd.f32 %v816_v37, %v551_v46  ;;  %v623_v52 = vadd.f32 %v622_v45, %v592_v47  ;;  %v606_v47 = vmul.f32 %v1024_v33, %v1024_v33 }
  0xf6   : > { %v624_v56 = vadd.f32 %v623_v52, %v593_v50  ;;  %v820_v57 = vpop.f32.mrb[8].mxu0  ;;  %v553_v58 = vadd.f32 %v817_v43, %v552_v51  ;;  %v604_v43 = vmul.f32 %v1026_v34, %v1026_v34 }
  0xf7   : > { %v451_v59 = vpop.f32.mrb[9].mxu0  ;;  %v836_v4 = vpop.f32.mrb[8].mxu1  ;;  %v597_v6 = vmul.f32 %v820_v57, %v820_v57 }
  0xf8   : > { %v554_v60 = vadd.f32 %v553_v58, %v451_v59  ;;  %v595_v61 = vmul.f32 %v451_v59, %v451_v59  ;;  %v625_v62 = vadd.f32 %v624_v56, %v594_v55  ;;  %v821_v63 = vpop.f32.mrb[10].mxu0  ;;  %v515_v5 = vpop.f32.mrb[9].mxu1  ;;  %v608_v58 = vmul.f32 %v502_v54, %v502_v54 }
  0xf9   : > { %v454_v0 = vpop.f32.mrb[11].mxu0  ;;  %v837_v9 = vpop.f32.mrb[10].mxu1  ;;  %v598_v11 = vmul.f32 %v821_v63, %v821_v63 }
  0xfa   : > { %v626_v1 = vadd.f32 %v625_v62, %v595_v61  ;;  %v555_v2 = vadd.f32 %v554_v60, %v454_v0  ;;  %v596_v3 = vmul.f32 %v454_v0, %v454_v0  ;;  %v518_v10 = vpop.f32.mrb[11].mxu1 }
  0xfc   : > { %v556_v7 = vadd.f32 %v820_v57, %v555_v2  ;;  %v627_v8 = vadd.f32 %v626_v1, %v596_v3  ;;  %v612_v2 = vmul.f32 %v518_v10, %v518_v10  ;;  %v613_v3 = vmul.f32 %v836_v4, %v836_v4 }
  0xfe   : > { %v628_v12 = vadd.f32 %v627_v8, %v597_v6  ;;  %v824_v13 = vpop.f32.mrb[12].mxu0  ;;  %v557_v14 = vadd.f32 %v821_v63, %v556_v7  ;;  %v611_v63 = vmul.f32 %v515_v5, %v515_v5  ;;  %v614_v7 = vmul.f32 %v837_v9, %v837_v9 }
  0xff   : > { %v467_v15 = vpop.f32.mrb[13].mxu0  ;;  %v840_v24 = vpop.f32.mrb[12].mxu1  ;;  %v601_v26 = vmul.f32 %v824_v13, %v824_v13 }
 0x100   : > { %v558_v16 = vadd.f32 %v557_v14, %v467_v15  ;;  %v599_v17 = vmul.f32 %v467_v15, %v467_v15  ;;  %v629_v18 = vadd.f32 %v628_v12, %v598_v11  ;;  %v825_v19 = vpop.f32.mrb[14].mxu0  ;;  %v531_v25 = vpop.f32.mrb[13].mxu1 }
 0x101   : > { %v470_v20 = vpop.f32.mrb[15].mxu0  ;;  %v841_v31 = vpop.f32.mrb[14].mxu1  ;;  %v602_v35 = vmul.f32 %v825_v19, %v825_v19 }
 0x102   : > { %v630_v21 = vadd.f32 %v629_v18, %v599_v17  ;;  %v559_v22 = vadd.f32 %v558_v16, %v470_v20  ;;  %v600_v23 = vmul.f32 %v470_v20, %v470_v20  ;;  %v534_v32 = vpop.f32.mrb[15].mxu1  ;;  %v617_v17 = vmul.f32 %v840_v24, %v840_v24 }
 0x103   : > { %v616_v16 = vmul.f32 %v534_v32, %v534_v32  ;;  %v618_v18 = vmul.f32 %v841_v31, %v841_v31 }
 0x104   : > { %v560_v27 = vadd.f32 %v824_v13, %v559_v22  ;;  %v631_v30 = vadd.f32 %v630_v21, %v600_v23 }
 0x106   : > { %v632_v36 = vadd.f32 %v631_v30, %v601_v26  ;;  %v561_v37 = vadd.f32 %v825_v19, %v560_v27 }
 0x108   : > { %v562_v39 = vadd.f32 %v561_v37, %v1022_v29  ;;  %v633_v40 = vadd.f32 %v632_v36, %v602_v35  ;;  %v607_v29 = vmul.f32 %v499_v49, %v499_v49  ;;  %v586_v36 = vld [vmem:[%s1016_s4] sm:$0x1] }
 0x10a   : > { %v634_v41 = vadd.f32 %v633_v40, %v603_v38  ;;  %v563_v42 = vadd.f32 %v562_v39, %v1026_v34  ;;  %v609_v34 = vmul.f32 %v1028_v48, %v1028_v48 }
 0x10c   : > { %v564_v45 = vadd.f32 %v1020_v28, %v563_v42  ;;  %v635_v46 = vadd.f32 %v634_v41, %v604_v43  ;;  %v610_v28 = vmul.f32 %v1030_v53, %v1030_v53 }
 0x10e   : > { %v636_v50 = vadd.f32 %v635_v46, %v605_v44  ;;  %v565_v51 = vadd.f32 %v1024_v33, %v564_v45 }
 0x110   : > { %v566_v52 = vadd.f32 %v565_v51, %v499_v49  ;;  %v637_v55 = vadd.f32 %v636_v50, %v606_v47 }
 0x112   : > { %v638_v56 = vadd.f32 %v637_v55, %v607_v29  ;;  %v567_v57 = vadd.f32 %v566_v52, %v502_v54 }
 0x114   : > { %v568_v59 = vadd.f32 %v1028_v48, %v567_v57  ;;  %v639_v60 = vadd.f32 %v638_v56, %v608_v58  ;;  %v615_v48 = vmul.f32 %v531_v25, %v531_v25 }
 0x116   : > { %v640_v61 = vadd.f32 %v639_v60, %v609_v34  ;;  %v569_v62 = vadd.f32 %v1030_v53, %v568_v59 }
 0x118   : > { %v570_v33 = vadd.f32 %v569_v62, %v515_v5  ;;  %v641_v0 = vadd.f32 %v640_v61, %v610_v28 }
 0x11a   : > { %v642_v49 = vadd.f32 %v641_v0, %v611_v63  ;;  %v571_v1 = vadd.f32 %v570_v33, %v518_v10 }
 0x11c   : > { %v572_v54 = vadd.f32 %v836_v4, %v571_v1  ;;  %v643_v6 = vadd.f32 %v642_v49, %v612_v2 }
 0x11e   : > { %v644_v8 = vadd.f32 %v643_v6, %v613_v3  ;;  %v573_v11 = vadd.f32 %v837_v9, %v572_v54 }
 0x120   : > { %v574_v12 = vadd.f32 %v573_v11, %v531_v25  ;;  %v645_v13 = vadd.f32 %v644_v8, %v614_v7 }
 0x122   : > { %v646_v14 = vadd.f32 %v645_v13, %v615_v48  ;;  %v575_v15 = vadd.f32 %v574_v12, %v534_v32  ;;  %v546_v32 = vld [vmem:[%s1010_s28] sm:$0x1] }
 0x124   : > { %v576_v53 = vadd.f32 %v840_v24, %v575_v15  ;;  %v647_v5 = vadd.f32 %v646_v14, %v616_v16 }
 0x126   : > { %v577_v19 = vadd.f32 %v841_v31, %v576_v53  ;;  %v648_v10 = vadd.f32 %v647_v5, %v617_v17 }
 0x128   : > { %v578_v20 = vrot.slane %v577_v19, 4  ;;  %v649_v4 = vadd.f32 %v648_v10, %v618_v18 }
 0x12a   : > { %v579_v21 = vadd.f32 %v578_v20, %v577_v19  ;;  %v650_v9 = vrot.slane %v649_v4, 4 }
 0x12c   : > { %v580_v22 = vrot.slane %v579_v21, 2  ;;  %v651_v23 = vadd.f32 %v650_v9, %v649_v4 }
 0x12e   : > { %v581_v25 = vadd.f32 %v580_v22, %v579_v21  ;;  %v652_v26 = vrot.slane %v651_v23, 2 }
 0x130   : > { %v582_v27 = vrot.slane %v581_v25, 1  ;;  %v653_v30 = vadd.f32 %v652_v26, %v651_v23 }
 0x132   : > { %v583_v35 = vadd.f32 %v582_v27, %v581_v25  ;;  %v654_v24 = vrot.slane %v653_v30, 1 }
 0x134   : > { %v584_v37 = vadd.f32 %v583_v35, %v546_v32  ;;  %v655_v38 = vadd.f32 %v654_v24, %v653_v30 }
 0x136   : > { %585 = vst [vmem:[%s1010_s28] sm:$0x1] %v584_v37  ;;  %v656_v31 = vadd.f32 %v655_v38, %v586_v36 }
 0x138   : > { %657 = vst [vmem:[%s1016_s4] sm:$0x1] %v656_v31 }
 0x139 PF: > { %s14_s14 = sadd.s32 1, %s916_s14   ;;  %s1067_s12 = smov %s912_s13 }
 0x13a   : > { %p11_p5 = scmp.ge.s32.totalorder %s14_s14, 4   ;;  %s1068_s13 = smov %s1070_s15 }
 0x13c   :  { %13 = sbr.rel (!%p11_p5) target bundleno = 2 (0x2), region = 75 }

</bundles_post_ra>
